<compile_context>
chip_gen: v6e
topology: v6e:2x2x1
jax: 0.10.0
libtpu: 0.0.40
codegen_flags: <defaults>
</compile_context>

<pallas_src>
import jax
import jax.numpy as jnp
import numpy as np
from jax.experimental import pallas as pl
from jax.experimental.pallas import tpu as pltpu


# ----------------------------- Pallas kernel --------------------------------

def _make_block_conv_kernel(N, H, WC, K):
    """Fused (conv3x3+BN+ReLU) x2 + residual-add for the whole batch."""
    M = N * H            # batch folded into the matmul M dimension

    def kernel(x_ref, w1_ref, bias1_ref, w2_ref, bias2_ref, out_ref, a_ref):
        # x_ref:     (N, H, W*C)    f32   lane-dense activations
        # w*_ref:    (K*W*C, W*C)   bf16  banded, BN-scale-folded conv weights
        # bias*_ref: (1, W*C)       f32   folded BN bias tiled across W
        # a_ref:     (N*H, K*W*C)   f32   VMEM im2row scratch
        #
        # Zero the im2row scratch ONCE.  Only the H-padding border cells
        # (row n*H of the kh=0 block, row n*H+H-1 of the kh=2 block) rely on
        # staying zero; the interior is fully rewritten before every matmul.
        a_ref[...] = jnp.zeros(a_ref.shape, a_ref.dtype)

        x = x_ref[...]                                        # (N, H, WC) f32

        def conv_bn_relu(act, w_ref, bias_ref):
            # act: (N, H, WC) f32.  Scatter the three kh taps into the im2row
            # scratch: column block kh holds activation row h + kh - 1 (rows
            # falling outside [0, H) are the zero padding left from the init).
            a_ref[pl.ds(0, M), pl.ds(WC, WC)] = act.reshape(M, WC)           # kh = 1
            for n in range(N):                                               # unrolled; N tiny
                r = n * H
                a_ref[pl.ds(r + 1, H - 1), pl.ds(0, WC)] = act[n, :H - 1, :]      # kh = 0
                a_ref[pl.ds(r, H - 1), pl.ds(2 * WC, WC)] = act[n, 1:, :]         # kh = 2
            # One bf16 MXU matmul per conv: (N*H, 3*WC) x (3*WC, WC), f32 accum.
            acc = jnp.dot(a_ref[...].astype(jnp.bfloat16), w_ref[...],
                          preferred_element_type=jnp.float32)
            return jnp.maximum(acc + bias_ref[...], 0.0)                     # f32 epilogue

        h = conv_bn_relu(x, w1_ref, bias1_ref)                               # (M, WC) f32
        y = conv_bn_relu(h.reshape(N, H, WC), w2_ref, bias2_ref)
        out_ref[...] = x + y.reshape(N, H, WC)                               # residual add

    return kernel


# --------------------------- wrapper / weight prep ---------------------------

def _banded_conv_weight(w_hwio, W):
    """3x3 HWIO conv weight -> (K*W*Cin, W*Cout) banded matmul weight.

    With activations laid out as (H rows, W*Cin lanes), the conv becomes
        y[h] = concat_kh( xpad[h + kh - 1, :] ) @ B          (one matmul)
    where xpad zero-pads only the H dimension.  The width-padding taps would
    multiply guaranteed-zero input, so their columns are simply omitted: the
    contraction depth per tap is exactly W*Cin.

    NOTE(scaling): this banded form has K*W*Cin*W*Cout elements and grows
    quadratically in W and in C; at e.g. W=64, C=64 it would blow past v7x's
    64 MiB VMEM.  For larger shapes switch to per-(kh,kw) CxC blocks with
    pltpu.roll lane shifts, or tile W with a BlockSpec.
    """
    K, _, Cin, Cout = w_hwio.shape
    assert K == 3, "BlockConv uses 3x3 convs with padding=1"
    band = np.zeros((K, W * Cin, W * Cout), np.float32)
    for kh in range(K):
        for w in range(W):
            for kw in range(K):
                j = w + kw - 1                      # input width index
                if 0 <= j < W:                      # OOB taps hit zero padding -> omit
                    band[kh, j * Cin:(j + 1) * Cin,
                         w * Cout:(w + 1) * Cout] = w_hwio[kh, kw]
    return band.reshape(K * W * Cin, W * Cout)      # kh-major rows


def prepare_block_conv_params(params, W):
    """Fold BN into the convs; build bf16 banded weights and f32 tiled biases."""
    def prep(layer):
        wt = (np.asarray(layer["w"], np.float32)
              * np.asarray(layer["scale"], np.float32))          # fold BN scale (per Cout)
        band = jnp.asarray(_banded_conv_weight(wt, W), jnp.bfloat16)
        bias = jnp.asarray(
            np.tile(np.asarray(layer["bias"], np.float32), W).reshape(1, -1),
            jnp.float32)
        return band, bias

    w1, b1 = prep(params["conv1"])
    w2, b2 = prep(params["conv2"])
    return w1, b1, w2, b2


def block_conv_forward(x_nchw, prepped):
    """BlockConv forward: x + ReLU(BN(Conv(ReLU(BN(Conv(x)))))).  NCHW in/out."""
    N, C, H, W = x_nchw.shape
    K = 3
    WC = W * C
    w1, bias1, w2, bias2 = prepped

    # NCHW -> (N, H, W*C): width*channels folded onto the 128-lane axis.
    x = jnp.transpose(x_nchw, (0, 2, 3, 1)).reshape(N, H, WC).astype(jnp.float32)

    kernel = _make_block_conv_kernel(N, H, WC, K)

    flops = 2 * 2 * (N * H) * (K * WC) * WC              # 2 convs, 1 matmul each
    bytes_accessed = (2 * x.size * 4                     # x in + out
                      + 2 * (K * WC * WC) * 2            # bf16 banded weights
                      + 2 * WC * 4)                      # biases

    out = pl.pallas_call(
        kernel,
        out_shape=jax.ShapeDtypeStruct((N, H, WC), jnp.float32),
        scratch_shapes=[pltpu.VMEM((N * H, K * WC), jnp.float32)],
        cost_estimate=pl.CostEstimate(
            flops=flops, transcendentals=0, bytes_accessed=bytes_accessed),
    )(x, w1, bias1, w2, bias2)

    # (N, H, W*C) -> NCHW
    return jnp.transpose(out.reshape(N, H, W, C), (0, 3, 1, 2))


# --------------------------- parameter creation ------------------------------

def _init_conv_bn(key, c, k=3):
    """Synthetic Conv2d + BatchNorm2d params; BN folded to (scale, bias)."""
    k1, k2, k3, k4, k5, k6 = jax.random.split(key, 6)
    w = 0.1 * jax.random.normal(k1, (k, k, c, c), jnp.float32)      # HWIO
    b = 0.05 * jax.random.normal(k2, (c,), jnp.float32)             # conv bias
    gamma = 1.0 + 0.1 * jax.random.normal(k3, (c,), jnp.float32)
    beta = 0.1 * jax.random.normal(k4, (c,), jnp.float32)
    mean = 0.1 * jax.random.normal(k5, (c,), jnp.float32)
    var = 1.0 + 0.1 * jnp.abs(jax.random.normal(k6, (c,), jnp.float32))
    eps = 1e-5
    scale = gamma / jnp.sqrt(var + eps)
    bias = (b - mean) * scale + beta
    return {"w": w, "scale": scale, "bias": bias}


def init_block_conv(key, out_channels):
    k1, k2 = jax.random.split(key)
    return {"conv1": _init_conv_bn(k1, out_channels),
            "conv2": _init_conv_bn(k2, out_channels)}


# ------------------------------ pure-JAX ref ----------------------------------

def _ref_conv_bn_relu(x, w, scale, bias):
    y = jax.lax.conv_general_dilated(
        x, w, (1, 1), [(1, 1), (1, 1)],
        dimension_numbers=("NHWC", "HWIO", "NHWC"),
        precision=jax.lax.Precision.HIGHEST)
    return jnp.maximum(y * scale + bias, 0.0)


def _ref_forward(x_nchw, params):
    x = jnp.transpose(x_nchw, (0, 2, 3, 1)).astype(jnp.float32)
    c1, c2 = params["conv1"], params["conv2"]
    h = _ref_conv_bn_relu(x, c1["w"], c1["scale"], c1["bias"])
    h = _ref_conv_bn_relu(h, c2["w"], c2["scale"], c2["bias"])
    return jnp.transpose(x + h, (0, 3, 1, 2))


# ---------------------------------- main --------------------------------------

if __name__ == "__main__":
    # BlockConv(out_channels=8) on a (2, 8, 16, 16) NCHW input (W*C = 128 lanes).
    out_channels = 8
    N, H, W = 2, 16, 16

    key = jax.random.PRNGKey(0)
    kx, kp = jax.random.split(key)
    x = jax.random.normal(kx, (N, out_channels, H, W), jnp.float32)   # NCHW
    params = init_block_conv(kp, out_channels)
    prepped = prepare_block_conv_params(params, W)                    # bf16 banded weights

    fwd = jax.jit(lambda xx: block_conv_forward(xx, prepped))
    out = fwd(x)
    jax.block_until_ready(out)

    ref = _ref_forward(x, params)
    assert out.shape == ref.shape == (N, out_channels, H, W)
    # bf16 MXU operands (f32 accumulation + f32 epilogue) vs f32 reference:
    # slightly looser atol covers the bf16 operand rounding of two stacked convs.
    np.testing.assert_allclose(np.asarray(out), np.asarray(ref),
                               rtol=1e-2, atol=2e-2)

    print("KERNEL_OK")
</pallas_src>

<mosaic_0001>
module attributes {stable_mosaic.version = 11 : i64} {
  func.func @kernel(%arg0: memref<2x16x128xf32, #tpu.memory_space<vmem>>, %arg1: memref<384x128xbf16, #tpu.memory_space<vmem>>, %arg2: memref<1x128xf32, #tpu.memory_space<vmem>>, %arg3: memref<384x128xbf16, #tpu.memory_space<vmem>>, %arg4: memref<1x128xf32, #tpu.memory_space<vmem>>, %arg5: memref<2x16x128xf32, #tpu.memory_space<vmem>>, %arg6: memref<32x384xf32, #tpu.memory_space<vmem>>) attributes {dimension_semantics = [], scalar_prefetch = 0 : i64, scratch_operands = 1 : i64, tpu.core_type = #tpu.core_type<tc>} {
    %cst = arith.constant 0.000000e+00 : f32
    %0 = vector.broadcast %cst : f32 to vector<32x384xf32>
    %c0 = arith.constant 0 : index
    %c0_0 = arith.constant 0 : index
    %1 = vector.load %arg6[%c0, %c0_0] : memref<32x384xf32, #tpu.memory_space<vmem>>, vector<32x384xf32>
    tpu.vector_store %arg6[%c0, %c0_0], %0 {strides = array<i32>} : memref<32x384xf32, #tpu.memory_space<vmem>>, vector<32x384xf32>,
    %c0_1 = arith.constant 0 : index
    %c0_2 = arith.constant 0 : index
    %c0_3 = arith.constant 0 : index
    %2 = vector.load %arg0[%c0_1, %c0_2, %c0_3] : memref<2x16x128xf32, #tpu.memory_space<vmem>>, vector<2x16x128xf32>
    %3 = vector.shape_cast %2 : vector<2x16x128xf32> to vector<32x128xf32>
    %c0_4 = arith.constant 0 : index
    %c128 = arith.constant 128 : index
    %4 = vector.load %arg6[%c0_4, %c128] : memref<32x384xf32, #tpu.memory_space<vmem>>, vector<32x128xf32>
    tpu.vector_store %arg6[%c0_4, %c128], %3 {strides = array<i32>} : memref<32x384xf32, #tpu.memory_space<vmem>>, vector<32x128xf32>,
    %5 = vector.extract_strided_slice %2 {offsets = [0, 0, 0], sizes = [1, 15, 128], strides = [1, 1, 1]} : vector<2x16x128xf32> to vector<1x15x128xf32>
    %6 = vector.shape_cast %5 : vector<1x15x128xf32> to vector<15x128xf32>
    %c1 = arith.constant 1 : index
    %c0_5 = arith.constant 0 : index
    %7 = vector.load %arg6[%c1, %c0_5] : memref<32x384xf32, #tpu.memory_space<vmem>>, vector<15x128xf32>
    tpu.vector_store %arg6[%c1, %c0_5], %6 {strides = array<i32>} : memref<32x384xf32, #tpu.memory_space<vmem>>, vector<15x128xf32>,
    %8 = vector.extract_strided_slice %2 {offsets = [0, 1, 0], sizes = [1, 15, 128], strides = [1, 1, 1]} : vector<2x16x128xf32> to vector<1x15x128xf32>
    %9 = vector.shape_cast %8 : vector<1x15x128xf32> to vector<15x128xf32>
    %c0_6 = arith.constant 0 : index
    %c256 = arith.constant 256 : index
    %10 = vector.load %arg6[%c0_6, %c256] : memref<32x384xf32, #tpu.memory_space<vmem>>, vector<15x128xf32>
    tpu.vector_store %arg6[%c0_6, %c256], %9 {strides = array<i32>} : memref<32x384xf32, #tpu.memory_space<vmem>>, vector<15x128xf32>,
    %11 = vector.extract_strided_slice %2 {offsets = [1, 0, 0], sizes = [1, 15, 128], strides = [1, 1, 1]} : vector<2x16x128xf32> to vector<1x15x128xf32>
    %12 = vector.shape_cast %11 : vector<1x15x128xf32> to vector<15x128xf32>
    %c17 = arith.constant 17 : index
    %c0_7 = arith.constant 0 : index
    %13 = vector.load %arg6[%c17, %c0_7] : memref<32x384xf32, #tpu.memory_space<vmem>>, vector<15x128xf32>
    tpu.vector_store %arg6[%c17, %c0_7], %12 {strides = array<i32>} : memref<32x384xf32, #tpu.memory_space<vmem>>, vector<15x128xf32>,
    %14 = vector.extract_strided_slice %2 {offsets = [1, 1, 0], sizes = [1, 15, 128], strides = [1, 1, 1]} : vector<2x16x128xf32> to vector<1x15x128xf32>
    %15 = vector.shape_cast %14 : vector<1x15x128xf32> to vector<15x128xf32>
    %c16 = arith.constant 16 : index
    %c256_8 = arith.constant 256 : index
    %16 = vector.load %arg6[%c16, %c256_8] : memref<32x384xf32, #tpu.memory_space<vmem>>, vector<15x128xf32>
    tpu.vector_store %arg6[%c16, %c256_8], %15 {strides = array<i32>} : memref<32x384xf32, #tpu.memory_space<vmem>>, vector<15x128xf32>,
    %c0_9 = arith.constant 0 : index
    %c0_10 = arith.constant 0 : index
    %17 = vector.load %arg6[%c0_9, %c0_10] : memref<32x384xf32, #tpu.memory_space<vmem>>, vector<32x384xf32>
    %18 = arith.truncf %17 : vector<32x384xf32> to vector<32x384xbf16>
    %c0_11 = arith.constant 0 : index
    %c0_12 = arith.constant 0 : index
    %19 = vector.load %arg1[%c0_11, %c0_12] : memref<384x128xbf16, #tpu.memory_space<vmem>>, vector<384x128xbf16>
    %cst_13 = arith.constant dense<0.000000e+00> : vector<32x128xf32>
    %20 = tpu.matmul %18, %19, %cst_13 {dimension_numbers = #tpu.dot_dimension_numbers<[1], [0], [0], [1], [0, 0, 1, 1], [], []>} : vector<32x384xbf16>, vector<384x128xbf16>, vector<32x128xf32> -> vector<32x128xf32>
    %c0_14 = arith.constant 0 : index
    %c0_15 = arith.constant 0 : index
    %21 = vector.load %arg2[%c0_14, %c0_15] : memref<1x128xf32, #tpu.memory_space<vmem>>, vector<1x128xf32>
    %22 = vector.broadcast %21 : vector<1x128xf32> to vector<32x128xf32>
    %23 = arith.addf %20, %22 : vector<32x128xf32>
    %cst_16 = arith.constant 0.000000e+00 : f32
    %24 = vector.broadcast %cst_16 : f32 to vector<32x128xf32>
    %25 = arith.maximumf %23, %24 : vector<32x128xf32>
    %26 = vector.shape_cast %25 : vector<32x128xf32> to vector<2x16x128xf32>
    %27 = vector.shape_cast %26 : vector<2x16x128xf32> to vector<32x128xf32>
    %c0_17 = arith.constant 0 : index
    %c128_18 = arith.constant 128 : index
    %28 = vector.load %arg6[%c0_17, %c128_18] : memref<32x384xf32, #tpu.memory_space<vmem>>, vector<32x128xf32>
    tpu.vector_store %arg6[%c0_17, %c128_18], %27 {strides = array<i32>} : memref<32x384xf32, #tpu.memory_space<vmem>>, vector<32x128xf32>,
    %29 = vector.extract_strided_slice %26 {offsets = [0, 0, 0], sizes = [1, 15, 128], strides = [1, 1, 1]} : vector<2x16x128xf32> to vector<1x15x128xf32>
    %30 = vector.shape_cast %29 : vector<1x15x128xf32> to vector<15x128xf32>
    %c1_19 = arith.constant 1 : index
    %c0_20 = arith.constant 0 : index
    %31 = vector.load %arg6[%c1_19, %c0_20] : memref<32x384xf32, #tpu.memory_space<vmem>>, vector<15x128xf32>
    tpu.vector_store %arg6[%c1_19, %c0_20], %30 {strides = array<i32>} : memref<32x384xf32, #tpu.memory_space<vmem>>, vector<15x128xf32>,
    %32 = vector.extract_strided_slice %26 {offsets = [0, 1, 0], sizes = [1, 15, 128], strides = [1, 1, 1]} : vector<2x16x128xf32> to vector<1x15x128xf32>
    %33 = vector.shape_cast %32 : vector<1x15x128xf32> to vector<15x128xf32>
    %c0_21 = arith.constant 0 : index
    %c256_22 = arith.constant 256 : index
    %34 = vector.load %arg6[%c0_21, %c256_22] : memref<32x384xf32, #tpu.memory_space<vmem>>, vector<15x128xf32>
    tpu.vector_store %arg6[%c0_21, %c256_22], %33 {strides = array<i32>} : memref<32x384xf32, #tpu.memory_space<vmem>>, vector<15x128xf32>,
    %35 = vector.extract_strided_slice %26 {offsets = [1, 0, 0], sizes = [1, 15, 128], strides = [1, 1, 1]} : vector<2x16x128xf32> to vector<1x15x128xf32>
    %36 = vector.shape_cast %35 : vector<1x15x128xf32> to vector<15x128xf32>
    %c17_23 = arith.constant 17 : index
    %c0_24 = arith.constant 0 : index
    %37 = vector.load %arg6[%c17_23, %c0_24] : memref<32x384xf32, #tpu.memory_space<vmem>>, vector<15x128xf32>
    tpu.vector_store %arg6[%c17_23, %c0_24], %36 {strides = array<i32>} : memref<32x384xf32, #tpu.memory_space<vmem>>, vector<15x128xf32>,
    %38 = vector.extract_strided_slice %26 {offsets = [1, 1, 0], sizes = [1, 15, 128], strides = [1, 1, 1]} : vector<2x16x128xf32> to vector<1x15x128xf32>
    %39 = vector.shape_cast %38 : vector<1x15x128xf32> to vector<15x128xf32>
    %c16_25 = arith.constant 16 : index
    %c256_26 = arith.constant 256 : index
    %40 = vector.load %arg6[%c16_25, %c256_26] : memref<32x384xf32, #tpu.memory_space<vmem>>, vector<15x128xf32>
    tpu.vector_store %arg6[%c16_25, %c256_26], %39 {strides = array<i32>} : memref<32x384xf32, #tpu.memory_space<vmem>>, vector<15x128xf32>,
    %c0_27 = arith.constant 0 : index
    %c0_28 = arith.constant 0 : index
    %41 = vector.load %arg6[%c0_27, %c0_28] : memref<32x384xf32, #tpu.memory_space<vmem>>, vector<32x384xf32>
    %42 = arith.truncf %41 : vector<32x384xf32> to vector<32x384xbf16>
    %c0_29 = arith.constant 0 : index
    %c0_30 = arith.constant 0 : index
    %43 = vector.load %arg3[%c0_29, %c0_30] : memref<384x128xbf16, #tpu.memory_space<vmem>>, vector<384x128xbf16>
    %cst_31 = arith.constant dense<0.000000e+00> : vector<32x128xf32>
    %44 = tpu.matmul %42, %43, %cst_31 {dimension_numbers = #tpu.dot_dimension_numbers<[1], [0], [0], [1], [0, 0, 1, 1], [], []>} : vector<32x384xbf16>, vector<384x128xbf16>, vector<32x128xf32> -> vector<32x128xf32>
    %c0_32 = arith.constant 0 : index
    %c0_33 = arith.constant 0 : index
    %45 = vector.load %arg4[%c0_32, %c0_33] : memref<1x128xf32, #tpu.memory_space<vmem>>, vector<1x128xf32>
    %46 = vector.broadcast %45 : vector<1x128xf32> to vector<32x128xf32>
    %47 = arith.addf %44, %46 : vector<32x128xf32>
    %cst_34 = arith.constant 0.000000e+00 : f32
    %48 = vector.broadcast %cst_34 : f32 to vector<32x128xf32>
    %49 = arith.maximumf %47, %48 : vector<32x128xf32>
    %50 = vector.shape_cast %49 : vector<32x128xf32> to vector<2x16x128xf32>
    %51 = arith.addf %2, %50 : vector<2x16x128xf32>
    %c0_35 = arith.constant 0 : index
    %c0_36 = arith.constant 0 : index
    %c0_37 = arith.constant 0 : index
    %52 = vector.load %arg5[%c0_35, %c0_36, %c0_37] : memref<2x16x128xf32, #tpu.memory_space<vmem>>, vector<2x16x128xf32>
    tpu.vector_store %arg5[%c0_35, %c0_36, %c0_37], %51 {strides = array<i32>} : memref<2x16x128xf32, #tpu.memory_space<vmem>>, vector<2x16x128xf32>,
    return
  }
}

</mosaic_0001>

<bundles_post_ra>
// kernel: _lambda_.1
= control target key start
LH: loop header
LB: loop body
LE: loop exit
PB: predicated region body
PF: predicated region fallthrough
CT: control target
= control target key end

     0   :  { %v976_v1 = vmov 0.0   ;;  %vm51_vm0 = vcmask 1046528   ;;  %vm43_vm1 = vcmask 1040384   ;;  %s1213_s1 = inlined_call_operand.vmem [shape: bf16[384,128], index: 1, kind: input, shape index: {}]   ;;  %s1214_s0 = inlined_call_operand.vmem [shape: f32[2,16,128], index: 0, kind: input, shape index: {}]   ;;  %s1215_s3 = inlined_call_operand.vmem [shape: bf16[384,128], index: 3, kind: input, shape index: {}]   ;;  %s1216_s2 = inlined_call_operand.vmem [shape: f32[1,128], index: 2, kind: input, shape index: {}]   ;;  %s1217_s4 = inlined_call_operand.vmem [shape: f32[1,128], index: 4, kind: input, shape index: {}]   ;;  %s1218_s5 = inlined_call_operand.vmem [shape: f32[2,16,128], index: 5, kind: output, shape index: {}]  }
   0x1   :  { %v928_v0 = vld [vmem:[%s1213_s1 + $0x78] sm:$0xff]   ;;  %21 = vst [vmem:[#allocation2 + $0x30] sm:$0xff] %v976_v1  ;;  %26 = vst [vmem:[#allocation2 + $0x20] sm:$0xff] %v976_v1  ;;  %v931_v4 = vld [vmem:[%s1213_s1 + $0x70] sm:$0xff]  }
   0x2   :  { %27 = vst [vmem:[#allocation2 + $0x8] sm:$0xff] %v976_v1  ;;  %32 = vst [vmem:[#allocation2 + $0x40] sm:$0xff] %v976_v1  ;;  %v929_v2 = vld [vmem:[%s1213_s1 + $0xb8] sm:$0xff]   ;;  %811 = vmatprep.subr.bf16.mxu0 %v928_v0  ;;  %v932_v5 = vld [vmem:[%s1213_s1 + $0xb0] sm:$0xff]  }
   0x3   :  { %v930_v3 = vld [vmem:[%s1213_s1 + $0x38] sm:$0xff]   ;;  %887 = vmatprep.subr.bf16.mxu1 %v929_v2  ;;  %v933_v6 = vld [vmem:[%s1213_s1 + $0x30] sm:$0xff]   ;;  %v934_v7 = vld [vmem:[%s1213_s1 + $0x68] sm:$0xff]  }
   0x4   :  { %812 = vmatpush3.bf16.msra.mxu0 %v930_v3  ;;  %888 = vmatpush3.bf16.msra.mxu1 %v929_v2  ;;  %v935_v8 = vld [vmem:[%s1213_s1 + $0xa8] sm:$0xff]   ;;  %v937_v10 = vld [vmem:[%s1213_s1 + $0x60] sm:$0xff]   ;;  %v940_v13 = vld [vmem:[%s1213_s1 + $0x58] sm:$0xff]  }
   0x5   :  { %813 = vmatprep.subr.bf16.mxu0 %v931_v4  ;;  %889 = vmatprep.subr.bf16.mxu1 %v932_v5  ;;  %v936_v9 = vld [vmem:[%s1213_s1 + $0x28] sm:$0xff]   ;;  %v938_v11 = vld [vmem:[%s1213_s1 + $0xa0] sm:$0xff]   ;;  %v941_v14 = vld [vmem:[%s1213_s1 + $0x98] sm:$0xff]  }
   0x6   :  { %v939_v12 = vld [vmem:[%s1213_s1 + $0x20] sm:$0xff]   ;;  %v942_v15 = vld [vmem:[%s1213_s1 + $0x18] sm:$0xff]   ;;  %v943_v16 = vld [vmem:[%s1213_s1 + $0x50] sm:$0xff]  }
   0x7   :  { %v944_v17 = vld [vmem:[%s1213_s1 + $0x90] sm:$0xff]   ;;  %v946_v19 = vld [vmem:[%s1213_s1 + $0x48] sm:$0xff]   ;;  %v949_v22 = vld [vmem:[%s1213_s1 + $0x40] sm:$0xff]  }
   0x8   :  { %814 = vmatpush3.bf16.msra.mxu0 %v933_v6  ;;  %890 = vmatpush3.bf16.msra.mxu1 %v932_v5  ;;  %v945_v18 = vld [vmem:[%s1213_s1 + $0x10] sm:$0xff]   ;;  %v947_v20 = vld [vmem:[%s1213_s1 + $0x88] sm:$0xff]   ;;  %v1076_v23 = vld [vmem:[%s1214_s0] sm:$0xff] }
   0x9   :  { %815 = vmatprep.subr.bf16.mxu0 %v934_v7  ;;  %891 = vmatprep.subr.bf16.mxu1 %v935_v8  ;;  %v948_v21 = vld [vmem:[%s1213_s1 + $0x8] sm:$0xff]   ;;  %v1086_v25 = vld [vmem:[%s1214_s0 + $0x10] sm:$0xff]  ;;  %v950_v26 = vld [vmem:[%s1213_s1 + $0x80] sm:$0xff]   ;;  %v44_v32 = vrot.slane %v1076_v23, 7  ;;  %v52_v34 = vrot.slane %v1076_v23, 1 }
   0xa   :  { %v1081_v24 = vld [vmem:[%s1214_s0 + $0x8] sm:$0xff]  ;;  %v1097_v29 = vld [vmem:[%s1214_s0 + $0x18] sm:$0xff]  ;;  %v951_v30 = vld [vmem:[%s1213_s1] sm:$0xff]   ;;  %v61_v35 = vrot.slane %v1086_v25, 7  ;;  %v68_v36 = vrot.slane %v1086_v25, 1 }
   0xb   :  { %v88_v27 = vpack.c.bf16 %v1081_v24, %v1076_v23  ;;  %v53_v28 = vrot.slane %v1081_v24, 1  ;;  %v45_v31 = vrot.slane %v1081_v24, 7  ;;  %v69_v33 = vrot.slane %v1097_v29, 1  ;;  %49 = vst [vmem:[#allocation2 + $0x30] sm:$0xfe] %v44_v32  ;;  %v952_v37 = vld [vmem:[%s1215_s3 + $0x78] sm:$0xff]  }
   0xc   :  { %816 = vmatpush3.bf16.msra.mxu0 %v936_v9  ;;  %892 = vmatpush3.bf16.msra.mxu1 %v935_v8  ;;  %66 = vst [vmem:[#allocation2 + $0x8] sm:$0xfe] %v61_v35  ;;  %v953_v41 = vld [vmem:[%s1215_s3 + $0x38] sm:$0xff]   ;;  %v91_v46 = vpack.c.bf16 %v1097_v29, %v1086_v25  ;;  %v62_v47 = vrot.slane %v1097_v29, 7  ;;  %v954_v53 = vld [vmem:[%s1215_s3 + $0x70] sm:$0xff]   ;;  %v956_v55 = vld [vmem:[%s1215_s3 + $0x68] sm:$0xff]  }
   0xd   :  { %817 = vmatprep.subr.bf16.mxu0 %v937_v10  ;;  %893 = vmatprep.subr.bf16.mxu1 %v938_v11  ;;  %58 = vst [vmem:[#allocation2 + $0x20] sm:$0x7f] %v53_v28  ;;  %74 = vst [vmem:[#allocation2 + $0x40] sm:$0x7f] %v69_v33  ;;  %v54_v38 = vsel %vm51_vm0, %v52_v34, %v53_v28  ;;  %v46_v39 = vsel %vm43_vm1, %v44_v32, %v45_v31  ;;  %v955_v54 = vld [vmem:[%s1215_s3 + $0x30] sm:$0xff]   ;;  %v958_v56 = vld [vmem:[%s1215_s3 + $0x28] sm:$0xff]  }
   0xe   :  { %324 = vmatprep.mubr.bf16.mxu0 %v88_v27  ;;  %v70_v40 = vsel %vm51_vm0, %v68_v36, %v69_v33  ;;  %v63_v51 = vsel %vm43_vm1, %v61_v35, %v62_v47  ;;  %v957_v57 = vld [vmem:[%s1215_s3 + $0xb8] sm:$0xff]   ;;  %v959_v58 = vld [vmem:[%s1215_s3 + $0x60] sm:$0xff]   ;;  %v960_v60 = vld [vmem:[%s1215_s3 + $0xb0] sm:$0xff]  }
   0xf   :  { %v961_v59 = vld [vmem:[%s1215_s3 + $0x20] sm:$0xff]   ;;  %v962_v61 = vld [vmem:[%s1215_s3 + $0x58] sm:$0xff]   ;;  %v963_v63 = vld [vmem:[%s1215_s3 + $0xa8] sm:$0xff]  }
  0x10   :  { %818 = vmatpush3.bf16.msra.mxu0 %v939_v12  ;;  %894 = vmatpush3.bf16.msra.mxu1 %v938_v11  ;;  %v964_v62 = vld [vmem:[%s1215_s3 + $0x18] sm:$0xff]   ;;  %v965_v0 = vld [vmem:[%s1215_s3 + $0x50] sm:$0xff]   ;;  %v966_v2 = vld [vmem:[%s1215_s3 + $0xa0] sm:$0xff]  }
  0x11   :  { %819 = vmatprep.subr.bf16.mxu0 %v940_v13  ;;  %895 = vmatprep.subr.bf16.mxu1 %v941_v14  ;;  %v967_v1 = vld [vmem:[%s1215_s3 + $0x10] sm:$0xff]   ;;  %v968_v3 = vld [vmem:[%s1215_s3 + $0x48] sm:$0xff]   ;;  %v969_v5 = vld [vmem:[%s1215_s3 + $0x98] sm:$0xff]  }
  0x12   :  { %v75_v44 = vld [vmem:[#allocation2 + $0x30] sm:$0xff]  ;;  %v970_v4 = vld [vmem:[%s1215_s3 + $0x8] sm:$0xff]   ;;  %v971_v6 = vld [vmem:[%s1215_s3 + $0x40] sm:$0xff]  }
  0x13   :  { %v87_v48 = vpack.c.bf16 %v46_v39, %v75_v44  ;;  %v81_v50 = vld [vmem:[#allocation2 + $0x8] sm:$0xff]  ;;  %v973_v7 = vld [vmem:[%s1215_s3] sm:$0xff]   ;;  %v972_v8 = vld [vmem:[%s1215_s3 + $0x90] sm:$0xff]  }
  0x14   :  { %820 = vmatpush3.bf16.msra.mxu0 %v942_v15  ;;  %896 = vmatpush3.bf16.msra.mxu1 %v941_v14  ;;  %v80_v42 = vld [vmem:[#allocation2 + $0x20] sm:$0xff]  ;;  %v90_v52 = vpack.c.bf16 %v63_v51, %v81_v50  ;;  %v974_v9 = vld [vmem:[%s1215_s3 + $0x88] sm:$0xff]  }
  0x15   :  { %821 = vmatprep.subr.bf16.mxu0 %v943_v16  ;;  %897 = vmatprep.subr.bf16.mxu1 %v944_v17  ;;  %v89_v43 = vpack.c.bf16 %v80_v42, %v54_v38  ;;  %v86_v45 = vld [vmem:[#allocation2 + $0x40] sm:$0xff] }
  0x16   :  { %v92_v49 = vpack.c.bf16 %v86_v45, %v70_v40  ;;  %v975_v10 = vld [vmem:[%s1215_s3 + $0x80] sm:$0xff]  }
  0x17   :  { %903 = vmatprep.mubr.bf16.mxu1 %v89_v43  ;;  %v761_v14 = vld [vmem:[%s1216_s2] ss:$0 sm:$0xff] }
  0x18   :  { %822 = vmatpush3.bf16.msra.mxu0 %v945_v18  ;;  %898 = vmatpush3.bf16.msra.mxu1 %v944_v17 }
  0x19   :  { %823 = vmatprep.subr.bf16.mxu0 %v946_v19  ;;  %899 = vmatprep.subr.bf16.mxu1 %v947_v20 }
  0x1c   :  { %824 = vmatpush3.bf16.msra.mxu0 %v948_v21  ;;  %900 = vmatpush3.bf16.msra.mxu1 %v947_v20 }
  0x1d   :  { %825 = vmatprep.subr.bf16.mxu0 %v949_v22  ;;  %901 = vmatprep.subr.bf16.mxu1 %v950_v26 }
  0x20   :  { %826 = vmatpush3.bf16.msra.mxu0 %v951_v30  ;;  %902 = vmatpush3.bf16.msra.mxu1 %v950_v26 }
  0x21   :  { %849 = vmatprep.subr.bf16.mxu0 %v952_v37  ;;  %907 = vmatprep.subr.bf16.mxu1 %v957_v57 }
  0x23   :  { %325 = vmatmul.mubr.bf16.vlgmr.msra.gmra.mxu0 %v87_v48  ;;  %904 = vmatmul.mubr.bf16.vlgmr.msra.gmra.mxu1 %v92_v49 }
  0x24   :  { %332 = vmatprep.mubr.bf16.mxu0 %v91_v46  ;;  %850 = vmatpush3.bf16.msra.mxu0 %v953_v41 }
  0x25   :  { %851 = vmatprep.subr.bf16.mxu0 %v954_v53  ;;  %908 = vmatpush3.bf16.msra.mxu1 %v957_v57 }
  0x26   :  { %909 = vmatprep.subr.bf16.mxu1 %v960_v60 }
  0x28   :  { %852 = vmatpush3.bf16.msra.mxu0 %v955_v54 }
  0x29   :  { %853 = vmatprep.subr.bf16.mxu0 %v956_v55  ;;  %910 = vmatpush3.bf16.msra.mxu1 %v960_v60 }
  0x2a   :  { %911 = vmatprep.subr.bf16.mxu1 %v963_v63 }
  0x2b   :  { %333 = vmatmul.mubr.bf16.gmra.mxu0 %v90_v52 }
  0x2c   :  { %854 = vmatpush3.bf16.msra.mxu0 %v958_v56 }
  0x2d   :  { %855 = vmatprep.subr.bf16.mxu0 %v959_v58  ;;  %912 = vmatpush3.bf16.msra.mxu1 %v963_v63 }
  0x2e   :  { %913 = vmatprep.subr.bf16.mxu1 %v966_v2 }
  0x30   :  { %856 = vmatpush3.bf16.msra.mxu0 %v961_v59 }
  0x31   :  { %857 = vmatprep.subr.bf16.mxu0 %v962_v61  ;;  %914 = vmatpush3.bf16.msra.mxu1 %v966_v2 }
  0x32   :  { %915 = vmatprep.subr.bf16.mxu1 %v969_v5 }
  0x34   :  { %858 = vmatpush3.bf16.msra.mxu0 %v964_v62 }
  0x35   :  { %859 = vmatprep.subr.bf16.mxu0 %v965_v0  ;;  %916 = vmatpush3.bf16.msra.mxu1 %v969_v5 }
  0x36   :  { %917 = vmatprep.subr.bf16.mxu1 %v972_v8 }
  0x38   :  { %860 = vmatpush3.bf16.msra.mxu0 %v967_v1 }
  0x39   :  { %861 = vmatprep.subr.bf16.mxu0 %v968_v3  ;;  %918 = vmatpush3.bf16.msra.mxu1 %v972_v8  ;;  %v786_v8 = vld [vmem:[%s1217_s4] ss:$0 sm:$0xff] }
  0x3a   :  { %919 = vmatprep.subr.bf16.mxu1 %v974_v9 }
  0x3c   :  { %862 = vmatpush3.bf16.msra.mxu0 %v970_v4 }
  0x3d   :  { %863 = vmatprep.subr.bf16.mxu0 %v971_v6  ;;  %920 = vmatpush3.bf16.msra.mxu1 %v974_v9 }
  0x3e   :  { %921 = vmatprep.subr.bf16.mxu1 %v975_v10 }
  0x40   :  { %864 = vmatpush3.bf16.msra.mxu0 %v973_v7 }
  0x41   :  { %922 = vmatpush3.bf16.msra.mxu1 %v975_v10 }
  0xe3   :  { %v827_v11 = vpop.f32.mrf.mxu0  ;;  %v905_v12 = vpop.f32.mrf.mxu1 }
  0xe5   :  { %v828_v13 = vpop.f32.mrf.mxu0  ;;  %v375_v15 = vpop.f32.mrf.mxu1 }
  0xe6   :  { %v829_v16 = vadd.f32 %v828_v13, %v827_v11 }
  0xe7   :  { %v830_v17 = vpop.f32.mrf.mxu0  ;;  %v906_v19 = vpop.f32.mrf.mxu1 }
  0xe8   :  { %v327_v18 = vadd.f32 %v829_v16, %v761_v14 }
  0xe9   :  { %v831_v20 = vpop.f32.mrf.mxu0  ;;  %v378_v30 = vpop.f32.mrf.mxu1 }
  0xea   :  { %v376_v21 = vadd.f32 %v375_v15, %v327_v18  ;;  %v832_v22 = vadd.f32 %v831_v20, %v830_v17 }
  0xeb   :  { %v833_v26 = vpop.f32.mrf.mxu0 }
  0xec   :  { %v390_v27 = vmax.f32 %v376_v21, 0.0  ;;  %v330_v28 = vadd.f32 %v832_v22, %v761_v14 }
  0xed   :  { %v834_v31 = vpop.f32.mrf.mxu0 }
  0xee   :  { %v400_v32 = vrot.slane %v390_v27, 7  ;;  %v379_v33 = vadd.f32 %v378_v30, %v330_v28  ;;  %v835_v34 = vadd.f32 %v834_v31, %v833_v26  ;;  %v407_v38 = vrot.slane %v390_v27, 1 }
  0xef   :  { %v836_v35 = vpop.f32.mrf.mxu0 }
  0xf0   :  { %405 = vst [vmem:[#allocation2 + $0x30] sm:$0xfe] %v400_v32  ;;  %v391_v36 = vmax.f32 %v379_v33, 0.0  ;;  %v335_v37 = vadd.f32 %v835_v34, %v761_v14 }
  0xf1   :  { %v837_v39 = vpop.f32.mrf.mxu0 }
  0xf2   :  { %v401_v40 = vrot.slane %v391_v36, 7  ;;  %v408_v41 = vrot.slane %v391_v36, 1  ;;  %v384_v42 = vadd.f32 %v905_v12, %v335_v37  ;;  %v838_v43 = vadd.f32 %v837_v39, %v836_v35 }
  0xf3   :  { %v443_v44 = vpack.c.bf16 %v391_v36, %v390_v27 }
  0xf4   :  { %v402_v45 = vsel %vm43_vm1, %v400_v32, %v401_v40  ;;  %v409_v46 = vsel %vm51_vm0, %v407_v38, %v408_v41  ;;  %413 = vst [vmem:[#allocation2 + $0x20] sm:$0x7f] %v408_v41  ;;  %v392_v47 = vmax.f32 %v384_v42, 0.0  ;;  %v338_v48 = vadd.f32 %v838_v43, %v761_v14 }
  0xf5   :  { %679 = vmatprep.mubr.bf16.mxu0 %v443_v44 }
  0xf6   :  { %v416_v49 = vrot.slane %v392_v47, 7  ;;  %v387_v50 = vadd.f32 %v906_v19, %v338_v48  ;;  %v423_v54 = vrot.slane %v392_v47, 1 }
  0xf7   :  { %v430_v51 = vld [vmem:[#allocation2 + $0x30] sm:$0xff] }
  0xf8   :  { %421 = vst [vmem:[#allocation2 + $0x8] sm:$0xfe] %v416_v49  ;;  %v393_v52 = vmax.f32 %v387_v50, 0.0  ;;  %v442_v53 = vpack.c.bf16 %v402_v45, %v430_v51 }
  0xfa   :  { %v417_v55 = vrot.slane %v393_v52, 7  ;;  %v424_v56 = vrot.slane %v393_v52, 1  ;;  %680 = vmatmul.mubr.bf16.vlgmr.msra.gmra.mxu0 %v442_v53  ;;  %v446_v57 = vpack.c.bf16 %v393_v52, %v392_v47 }
  0xfb   :  { %v435_v58 = vld [vmem:[#allocation2 + $0x20] sm:$0xff] }
  0xfc   :  { %v418_v59 = vsel %vm43_vm1, %v416_v49, %v417_v55  ;;  %v425_v60 = vsel %vm51_vm0, %v423_v54, %v424_v56  ;;  %429 = vst [vmem:[#allocation2 + $0x40] sm:$0x7f] %v424_v56  ;;  %v444_v61 = vpack.c.bf16 %v435_v58, %v409_v46  ;;  %687 = vmatprep.mubr.bf16.mxu0 %v446_v57 }
  0xfe   :  { %923 = vmatprep.mubr.bf16.mxu1 %v444_v61 }
  0xff   :  { %v436_v62 = vld [vmem:[#allocation2 + $0x8] sm:$0xff] }
 0x100   :  { %v445_v63 = vpack.c.bf16 %v418_v59, %v436_v62 }
 0x102   :  { %688 = vmatmul.mubr.bf16.gmra.mxu0 %v445_v63 }
 0x103   :  { %v441_v0 = vld [vmem:[#allocation2 + $0x40] sm:$0xff] }
 0x104   :  { %v447_v1 = vpack.c.bf16 %v441_v0, %v425_v60 }
 0x106   :  { %924 = vmatmul.mubr.bf16.vlgmr.msra.gmra.mxu1 %v447_v1 }
 0x1ba   :  { %v865_v2 = vpop.f32.mrf.mxu0 }
 0x1bc   :  { %v866_v3 = vpop.f32.mrf.mxu0 }
 0x1bd   :  { %v867_v7 = vadd.f32 %v866_v3, %v865_v2 }
 0x1be   :  { %v868_v4 = vpop.f32.mrf.mxu0 }
 0x1bf   :  { %v682_v15 = vadd.f32 %v867_v7, %v786_v8 }
 0x1c0   :  { %v869_v5 = vpop.f32.mrf.mxu0 }
 0x1c1   :  { %v870_v13 = vadd.f32 %v869_v5, %v868_v4 }
 0x1c2   :  { %v871_v6 = vpop.f32.mrf.mxu0 }
 0x1c3   :  { %v685_v28 = vadd.f32 %v870_v13, %v786_v8 }
 0x1c4   :  { %v872_v9 = vpop.f32.mrf.mxu0 }
 0x1c5   :  { %v873_v10 = vadd.f32 %v872_v9, %v871_v6 }
 0x1c6   :  { %v925_v11 = vpop.f32.mrf.mxu1  ;;  %v874_v12 = vpop.f32.mrf.mxu0 }
 0x1c7   :  { %v690_v14 = vadd.f32 %v873_v10, %v786_v8 }
 0x1c8   :  { %v730_v16 = vpop.f32.mrf.mxu1  ;;  %v875_v17 = vpop.f32.mrf.mxu0 }
 0x1c9   :  { %v739_v18 = vadd.f32 %v925_v11, %v690_v14  ;;  %v731_v19 = vadd.f32 %v730_v16, %v682_v15  ;;  %v876_v20 = vadd.f32 %v875_v17, %v874_v12 }
 0x1ca   :  { %v926_v21 = vpop.f32.mrf.mxu1 }
 0x1cb   :  { %v747_v22 = vmax.f32 %v739_v18, 0.0  ;;  %v745_v26 = vmax.f32 %v731_v19, 0.0  ;;  %v693_v27 = vadd.f32 %v876_v20, %v786_v8 }
 0x1cc   :  { %v733_v30 = vpop.f32.mrf.mxu1 }
 0x1cd   :  { %v751_v31 = vadd.f32 %v747_v22, %v1086_v25  ;;  %v749_v32 = vadd.f32 %v745_v26, %v1076_v23  ;;  %v742_v33 = vadd.f32 %v926_v21, %v693_v27  ;;  %v734_v34 = vadd.f32 %v733_v30, %v685_v28 }
 0x1cf   :  { %755 = vst [vmem:[%s1218_s5 + $0x10] sm:$0xff] %v751_v31  ;;  %753 = vst [vmem:[%s1218_s5] sm:$0xff] %v749_v32  ;;  %v748_v35 = vmax.f32 %v742_v33, 0.0  ;;  %v746_v36 = vmax.f32 %v734_v34, 0.0 }
 0x1d1   :  { %v752_v37 = vadd.f32 %v748_v35, %v1097_v29  ;;  %v750_v38 = vadd.f32 %v746_v36, %v1081_v24 }
 0x1d3   :  { %756 = vst [vmem:[%s1218_s5 + $0x18] sm:$0xff] %v752_v37  ;;  %754 = vst [vmem:[%s1218_s5 + $0x8] sm:$0xff] %v750_v38 }

</bundles_post_ra>
